<compile_context>
chip_gen: v6e
topology: v6e:2x2x1
jax: 0.10.0
libtpu: 0.0.40
codegen_flags: <defaults>
</compile_context>

<pallas_src>
import math

import jax
import jax.numpy as jnp
from jax import lax
from jax.experimental import pallas as pl
from jax.experimental.pallas import tpu as pltpu

_LANES = 128            # vreg lane width
_MAX_TILE_ROWS = 2048   # 2048 x 128 f32 = 1 MiB per buffer

_INV_SQRT2 = 1.0 / math.sqrt(2.0)
_TANH_C = math.sqrt(2.0 / math.pi)


def _exact_gelu_kernel(x_ref, o_ref):
    """Exact erf-based GELU on t = x*2 - 1 (F.gelu default / gelu_forward_0)."""
    t = x_ref[...].astype(jnp.float32) * 2.0 - 1.0
    o_ref[...] = (t * 0.5 * (1.0 + lax.erf(t * _INV_SQRT2))).astype(o_ref.dtype)


def _tanh_gelu_kernel(x_ref, o_ref):
    """Tanh-approximated GELU on t = x*2 - 1 (gelu_forward_1)."""
    t = x_ref[...].astype(jnp.float32) * 2.0 - 1.0
    o_ref[...] = (
        0.5 * t * (1.0 + jnp.tanh(_TANH_C * (t + 0.044715 * t * t * t)))
    ).astype(o_ref.dtype)


def _apply_gelu(x, kernel):
    """Run `kernel` elementwise over `x` with a lane-dense tiled pallas_call."""
    orig_shape = x.shape
    orig_dtype = x.dtype
    n = x.size

    flat = x.reshape(-1)
    pad = (-n) % _LANES
    if pad:
        # Only hit for tensors whose size is not a multiple of 128 (typically
        # tiny); 128-divisible tensors take the zero-copy reshape path.
        flat = jnp.pad(flat, (0, pad))
    rows = flat.size // _LANES
    arr2d = flat.reshape(rows, _LANES)

    # Largest tile that fits the VMEM budget; small inputs go in one block
    # (block_shape equal to the full array dims is always legal), large inputs
    # stream in 1 MiB (f32) bursts with a Pallas-clipped ragged last block.
    tile_rows = rows if rows <= _MAX_TILE_ROWS else _MAX_TILE_ROWS
    grid = (pl.cdiv(rows, tile_rows),)

    out2d = pl.pallas_call(
        kernel,
        out_shape=jax.ShapeDtypeStruct((rows, _LANES), orig_dtype),
        grid=grid,
        in_specs=[pl.BlockSpec((tile_rows, _LANES), lambda i: (i, 0))],
        out_specs=pl.BlockSpec((tile_rows, _LANES), lambda i: (i, 0)),
        compiler_params=pltpu.CompilerParams(
            dimension_semantics=("parallel",),
            vmem_limit_bytes=32 * 1024 * 1024,
        ),
    )(arr2d)

    out_flat = out2d.reshape(-1)
    if pad:
        out_flat = out_flat[:n]
    return out_flat.reshape(orig_shape)


@jax.jit
def model_forward(x, y, z, w):
    return (
        _apply_gelu(x, _exact_gelu_kernel),   # F.gelu
        _apply_gelu(y, _exact_gelu_kernel),   # F.gelu
        _apply_gelu(z, _exact_gelu_kernel),   # gelu_forward_0 (same exact math)
        _apply_gelu(w, _tanh_gelu_kernel),    # gelu_forward_1 (tanh approx)
    )


def _ref_forward(x, y, z, w):
    """Pure-JAX reference for numerical sanity check."""
    def exact(t):
        t = t * 2.0 - 1.0
        return t * 0.5 * (1.0 + lax.erf(t / math.sqrt(2.0)))

    def tanh_approx(t):
        t = t * 2.0 - 1.0
        return 0.5 * t * (1.0 + jnp.tanh(_TANH_C * (t + 0.044715 * t ** 3)))

    return exact(x), exact(y), exact(z), tanh_approx(w)


if __name__ == "__main__":
    key = jax.random.PRNGKey(0)
    kx, ky, kz, kw = jax.random.split(key, 4)

    # Small shapes in the spirit of the original test (2D / 3D / 4D / 5D inputs).
    x = jax.random.uniform(kx, (2, 16), dtype=jnp.float32)
    y = jax.random.uniform(ky, (2, 4, 16), dtype=jnp.float32)
    z = jax.random.uniform(kz, (2, 3, 8, 16), dtype=jnp.float32)
    w = jax.random.uniform(kw, (2, 3, 5, 7, 9), dtype=jnp.float32)

    outs = model_forward(x, y, z, w)
    outs = jax.block_until_ready(outs)

    refs = _ref_forward(x, y, z, w)
    for o, r in zip(outs, refs):
        assert o.shape == r.shape and o.dtype == r.dtype
        assert float(jnp.max(jnp.abs(o - r))) < 1e-5

    print("KERNEL_OK")
</pallas_src>

<mosaic_0001>
module attributes {stable_mosaic.version = 11 : i64} {
  func.func @_tanh_gelu_kernel(%arg0: i32, %arg1: memref<15x128xf32, #tpu.memory_space<vmem>>, %arg2: memref<15x128xf32, #tpu.memory_space<vmem>>) attributes {dimension_semantics = [#tpu.dimension_semantics<parallel>], iteration_bounds = array<i64: 1>, scalar_prefetch = 0 : i64, scratch_operands = 0 : i64, tpu.core_type = #tpu.core_type<tc>, window_params = [{transform_indices = @transform_0, window_bounds = array<i64: 15, 128>}, {transform_indices = @transform_1, window_bounds = array<i64: 15, 128>}]} {
    %c0 = arith.constant 0 : index
    %c0_0 = arith.constant 0 : index
    %0 = vector.load %arg1[%c0, %c0_0] : memref<15x128xf32, #tpu.memory_space<vmem>>, vector<15x128xf32>
    %cst = arith.constant 2.000000e+00 : f32
    %1 = vector.broadcast %cst : f32 to vector<15x128xf32>
    %2 = arith.mulf %0, %1 : vector<15x128xf32>
    %cst_1 = arith.constant 1.000000e+00 : f32
    %3 = vector.broadcast %cst_1 : f32 to vector<15x128xf32>
    %4 = arith.subf %2, %3 : vector<15x128xf32>
    %cst_2 = arith.constant 5.000000e-01 : f32
    %5 = vector.broadcast %cst_2 : f32 to vector<15x128xf32>
    %6 = arith.mulf %5, %4 : vector<15x128xf32>
    %cst_3 = arith.constant 4.471500e-02 : f32
    %7 = vector.broadcast %cst_3 : f32 to vector<15x128xf32>
    %8 = arith.mulf %7, %4 : vector<15x128xf32>
    %9 = arith.mulf %8, %4 : vector<15x128xf32>
    %10 = arith.mulf %9, %4 : vector<15x128xf32>
    %11 = arith.addf %4, %10 : vector<15x128xf32>
    %cst_4 = arith.constant 0.797884583 : f32
    %12 = vector.broadcast %cst_4 : f32 to vector<15x128xf32>
    %13 = arith.mulf %12, %11 : vector<15x128xf32>
    %14 = math.tanh %13 : vector<15x128xf32>
    %cst_5 = arith.constant 1.000000e+00 : f32
    %15 = vector.broadcast %cst_5 : f32 to vector<15x128xf32>
    %16 = arith.addf %15, %14 : vector<15x128xf32>
    %17 = arith.mulf %6, %16 : vector<15x128xf32>
    %c0_6 = arith.constant 0 : index
    %c0_7 = arith.constant 0 : index
    %18 = vector.load %arg2[%c0_6, %c0_7] : memref<15x128xf32, #tpu.memory_space<vmem>>, vector<15x128xf32>
    tpu.vector_store %arg2[%c0_6, %c0_7], %17 {strides = array<i32>} : memref<15x128xf32, #tpu.memory_space<vmem>>, vector<15x128xf32>,
    return
  }
  func.func @transform_0(%arg0: i32) -> (i32, i32) {
    %c0_i32 = arith.constant 0 : i32
    %c0_i32_0 = arith.constant 0 : i32
    return %arg0, %c0_i32 : i32, i32
  }
  func.func @transform_1(%arg0: i32) -> (i32, i32) {
    %c0_i32 = arith.constant 0 : i32
    %c0_i32_0 = arith.constant 0 : i32
    return %arg0, %c0_i32 : i32, i32
  }
}

module attributes {stable_mosaic.version = 11 : i64} {
  func.func @_exact_gelu_kernel(%arg0: i32, %arg1: memref<6x128xf32, #tpu.memory_space<vmem>>, %arg2: memref<6x128xf32, #tpu.memory_space<vmem>>) attributes {dimension_semantics = [#tpu.dimension_semantics<parallel>], iteration_bounds = array<i64: 1>, scalar_prefetch = 0 : i64, scratch_operands = 0 : i64, tpu.core_type = #tpu.core_type<tc>, window_params = [{transform_indices = @transform_0, window_bounds = array<i64: 6, 128>}, {transform_indices = @transform_1, window_bounds = array<i64: 6, 128>}]} {
    %c0 = arith.constant 0 : index
    %c0_0 = arith.constant 0 : index
    %0 = vector.load %arg1[%c0, %c0_0] : memref<6x128xf32, #tpu.memory_space<vmem>>, vector<6x128xf32>
    %cst = arith.constant 2.000000e+00 : f32
    %1 = vector.broadcast %cst : f32 to vector<6x128xf32>
    %2 = arith.mulf %0, %1 : vector<6x128xf32>
    %cst_1 = arith.constant 1.000000e+00 : f32
    %3 = vector.broadcast %cst_1 : f32 to vector<6x128xf32>
    %4 = arith.subf %2, %3 : vector<6x128xf32>
    %cst_2 = arith.constant 5.000000e-01 : f32
    %5 = vector.broadcast %cst_2 : f32 to vector<6x128xf32>
    %6 = arith.mulf %4, %5 : vector<6x128xf32>
    %cst_3 = arith.constant 0.707106769 : f32
    %7 = vector.broadcast %cst_3 : f32 to vector<6x128xf32>
    %8 = arith.mulf %4, %7 : vector<6x128xf32>
    %9 = math.erf %8 : vector<6x128xf32>
    %cst_4 = arith.constant 1.000000e+00 : f32
    %10 = vector.broadcast %cst_4 : f32 to vector<6x128xf32>
    %11 = arith.addf %10, %9 : vector<6x128xf32>
    %12 = arith.mulf %6, %11 : vector<6x128xf32>
    %c0_5 = arith.constant 0 : index
    %c0_6 = arith.constant 0 : index
    %13 = vector.load %arg2[%c0_5, %c0_6] : memref<6x128xf32, #tpu.memory_space<vmem>>, vector<6x128xf32>
    tpu.vector_store %arg2[%c0_5, %c0_6], %12 {strides = array<i32>} : memref<6x128xf32, #tpu.memory_space<vmem>>, vector<6x128xf32>,
    return
  }
  func.func @transform_0(%arg0: i32) -> (i32, i32) {
    %c0_i32 = arith.constant 0 : i32
    %c0_i32_0 = arith.constant 0 : i32
    return %arg0, %c0_i32 : i32, i32
  }
  func.func @transform_1(%arg0: i32) -> (i32, i32) {
    %c0_i32 = arith.constant 0 : i32
    %c0_i32_0 = arith.constant 0 : i32
    return %arg0, %c0_i32 : i32, i32
  }
}

module attributes {stable_mosaic.version = 11 : i64} {
  func.func @_exact_gelu_kernel(%arg0: i32, %arg1: memref<1x128xf32, #tpu.memory_space<vmem>>, %arg2: memref<1x128xf32, #tpu.memory_space<vmem>>) attributes {dimension_semantics = [#tpu.dimension_semantics<parallel>], iteration_bounds = array<i64: 1>, scalar_prefetch = 0 : i64, scratch_operands = 0 : i64, tpu.core_type = #tpu.core_type<tc>, window_params = [{transform_indices = @transform_0, window_bounds = array<i64: 1, 128>}, {transform_indices = @transform_1, window_bounds = array<i64: 1, 128>}]} {
    %c0 = arith.constant 0 : index
    %c0_0 = arith.constant 0 : index
    %0 = vector.load %arg1[%c0, %c0_0] : memref<1x128xf32, #tpu.memory_space<vmem>>, vector<1x128xf32>
    %cst = arith.constant 2.000000e+00 : f32
    %1 = vector.broadcast %cst : f32 to vector<1x128xf32>
    %2 = arith.mulf %0, %1 : vector<1x128xf32>
    %cst_1 = arith.constant 1.000000e+00 : f32
    %3 = vector.broadcast %cst_1 : f32 to vector<1x128xf32>
    %4 = arith.subf %2, %3 : vector<1x128xf32>
    %cst_2 = arith.constant 5.000000e-01 : f32
    %5 = vector.broadcast %cst_2 : f32 to vector<1x128xf32>
    %6 = arith.mulf %4, %5 : vector<1x128xf32>
    %cst_3 = arith.constant 0.707106769 : f32
    %7 = vector.broadcast %cst_3 : f32 to vector<1x128xf32>
    %8 = arith.mulf %4, %7 : vector<1x128xf32>
    %9 = math.erf %8 : vector<1x128xf32>
    %cst_4 = arith.constant 1.000000e+00 : f32
    %10 = vector.broadcast %cst_4 : f32 to vector<1x128xf32>
    %11 = arith.addf %10, %9 : vector<1x128xf32>
    %12 = arith.mulf %6, %11 : vector<1x128xf32>
    %c0_5 = arith.constant 0 : index
    %c0_6 = arith.constant 0 : index
    %13 = vector.load %arg2[%c0_5, %c0_6] : memref<1x128xf32, #tpu.memory_space<vmem>>, vector<1x128xf32>
    tpu.vector_store %arg2[%c0_5, %c0_6], %12 {strides = array<i32>} : memref<1x128xf32, #tpu.memory_space<vmem>>, vector<1x128xf32>,
    return
  }
  func.func @transform_0(%arg0: i32) -> (i32, i32) {
    %c0_i32 = arith.constant 0 : i32
    %c0_i32_0 = arith.constant 0 : i32
    return %arg0, %c0_i32 : i32, i32
  }
  func.func @transform_1(%arg0: i32) -> (i32, i32) {
    %c0_i32 = arith.constant 0 : i32
    %c0_i32_0 = arith.constant 0 : i32
    return %arg0, %c0_i32 : i32, i32
  }
}

</mosaic_0001>

<bundles_post_ra>
// kernel: model_forward.7
= control target key start
LH: loop header
LB: loop body
LE: loop exit
PB: predicated region body
PF: predicated region fallthrough
CT: control target
= control target key end

     0   :  { %s66_s0 = inlined_call_operand.vmem [shape: f32[15,128], index: 0, kind: input, shape index: {}]   ;;  %s67_s1 = inlined_call_operand.vmem [shape: f32[15,128], index: 1, kind: output, shape index: {}]  }
   0x1   :  { %v8_v0 = vld [vmem:[%s66_s0] sm:$0xff]  ;;  %v9_v1 = vld [vmem:[%s66_s0 + $0x8] sm:$0x7f] }
   0x2   :  { %v10_v2 = vmul.f32 2.0, %v8_v0  ;;  %v11_v3 = vmul.f32 2.0, %v9_v1 }
   0x4   :  { %v38_v4 = vadd.f32 -1.0, %v10_v2  ;;  %v39_v5 = vadd.f32 -1.0, %v11_v3 }
   0x6   :  { %v16_v6 = vmul.f32 0.044715, %v38_v4  ;;  %v17_v7 = vmul.f32 0.044715, %v39_v5  ;;  %v14_v16 = vmul.f32 0.5, %v38_v4  ;;  %v15_v18 = vmul.f32 0.5, %v39_v5 }
   0x8   :  { %v18_v8 = vmul.f32 %v38_v4, %v16_v6  ;;  %v19_v9 = vmul.f32 %v39_v5, %v17_v7 }
   0xa   :  { %v20_v10 = vmul.f32 %v38_v4, %v18_v8  ;;  %v21_v11 = vmul.f32 %v39_v5, %v19_v9 }
   0xc   :  { %v22_v12 = vadd.f32 %v38_v4, %v20_v10  ;;  %v23_v13 = vadd.f32 %v39_v5, %v21_v11 }
   0xe   :  { %v24_v14 = vmul.f32 0.7978846, %v22_v12  ;;  %v25_v15 = vmul.f32 0.7978846, %v23_v13 }
  0x10   :  { %40 = vtanh.f32 %v24_v14 }
  0x11   :  { %42 = vtanh.f32 %v25_v15 }
  0x1d   :  { %v41_v17 = vpop.eup %40 }
  0x1e   :  { %v43_v19 = vpop.eup %42  ;;  %v28_v20 = vadd.f32 1.0, %v41_v17 }
  0x1f   :  { %v29_v21 = vadd.f32 1.0, %v43_v19 }
  0x20   :  { %v30_v22 = vmul.f32 %v28_v20, %v14_v16 }
  0x21   :  { %v31_v23 = vmul.f32 %v29_v21, %v15_v18 }
  0x22   :  { %32 = vst [vmem:[%s67_s1] sm:$0xff] %v30_v22 }
  0x23   :  { %33 = vst [vmem:[%s67_s1 + $0x8] sm:$0x7f] %v31_v23 }

// kernel: model_forward.6
= control target key start
LH: loop header
LB: loop body
LE: loop exit
PB: predicated region body
PF: predicated region fallthrough
CT: control target
= control target key end

     0   :  { %s40_s0 = inlined_call_operand.vmem [shape: f32[6,128], index: 0, kind: input, shape index: {}]   ;;  %s41_s1 = inlined_call_operand.vmem [shape: f32[6,128], index: 1, kind: output, shape index: {}]  }
   0x1   :  { %v8_v0 = vld [vmem:[%s40_s0] sm:$0x3f] }
   0x2   :  { %v9_v1 = vmul.f32 2.0, %v8_v0 }
   0x4   :  { %v21_v2 = vadd.f32 -1.0, %v9_v1 }
   0x6   :  { %v12_v3 = vmul.f32 0.70710677, %v21_v2  ;;  %v11_v4 = vmul.f32 0.5, %v21_v2 }
   0x8   :  { %22 = verf.f32 %v12_v3 }
  0x15   :  { %v23_v5 = vpop.eup %22 }
  0x16   :  { %v14_v6 = vadd.f32 1.0, %v23_v5 }
  0x18   :  { %v15_v7 = vmul.f32 %v14_v6, %v11_v4 }
  0x1a   :  { %16 = vst [vmem:[%s41_s1] sm:$0x3f] %v15_v7 }

// kernel: model_forward.5
= control target key start
LH: loop header
LB: loop body
LE: loop exit
PB: predicated region body
PF: predicated region fallthrough
CT: control target
= control target key end

     0   :  { %s40_s0 = inlined_call_operand.vmem [shape: f32[1,128], index: 0, kind: input, shape index: {}]   ;;  %s41_s1 = inlined_call_operand.vmem [shape: f32[1,128], index: 1, kind: output, shape index: {}]  }
   0x1   :  { %v8_v0 = vld [vmem:[%s40_s0] sm:$0x1] }
   0x2   :  { %v9_v1 = vmul.f32 2.0, %v8_v0 }
   0x4   :  { %v21_v2 = vadd.f32 -1.0, %v9_v1 }
   0x6   :  { %v12_v3 = vmul.f32 0.70710677, %v21_v2  ;;  %v11_v4 = vmul.f32 0.5, %v21_v2 }
   0x8   :  { %22 = verf.f32 %v12_v3 }
  0x15   :  { %v23_v5 = vpop.eup %22 }
  0x16   :  { %v14_v6 = vadd.f32 1.0, %v23_v5 }
  0x18   :  { %v15_v7 = vmul.f32 %v14_v6, %v11_v4 }
  0x1a   :  { %16 = vst [vmem:[%s41_s1] sm:$0x1] %v15_v7 }

</bundles_post_ra>
